<compile_context>
chip_gen: v5e
topology: v5e:2x2
jax: 0.10.0
libtpu: 0.0.40
codegen_flags: <defaults>
</compile_context>

<pallas_src>
import jax
import jax.numpy as jnp
from jax.experimental import pallas as pl
from jax.experimental.pallas import tpu as pltpu


def _make_kernel(B, N, TB, TN):
    need_row_mask = (B % TB) != 0
    need_col_mask = (N % TN) != 0

    def kernel(has_ref, pred_ref, gt_ref, out_ref):
        i = pl.program_id(0)  # batch chunk
        j = pl.program_id(1)  # feature chunk

        # Elementwise squared error, computed in f32 (cast in-kernel; VPU work).
        diff = pred_ref[...].astype(jnp.float32) - gt_ref[...].astype(jnp.float32)
        sq = diff * diff  # (TB, TN)

        # Mask ragged feature tail (cheap (1, TN) iota, broadcast by where).
        if need_col_mask:
            cols = j * TN + jax.lax.broadcasted_iota(jnp.int32, (1, TN), 1)
            sq = jnp.where(cols < N, sq, 0.0)

        # Lane reduction first (XLU), then apply has on the (TB, 1) column.
        row_sums = jnp.sum(sq, axis=1, keepdims=True)          # (TB, 1)
        contrib = has_ref[...].astype(jnp.float32) * row_sums  # (TB, 1)

        # Mask ragged batch tail (select on the product, NOT 0*inf).
        if need_row_mask:
            rows = i * TB + jax.lax.broadcasted_iota(jnp.int32, (TB, 1), 0)
            contrib = jnp.where(rows < B, contrib, 0.0)

        total = jnp.sum(contrib)
        # Lane-dense store of this step's scalar partial into its own block.
        out_ref[...] = jnp.zeros_like(out_ref) + total

    return kernel


def parameter_loss(pred_param, gt_param, has_param, *,
                   tb=512, tn=1024, min_pallas_bytes=1 << 18):
    """JAX wrapper matching ParameterLoss.forward(pred, gt, has)."""
    assert pred_param.shape == gt_param.shape
    B = pred_param.shape[0]

    # 2-D views in the original dtype (no pad, no f32 copy in HBM).
    pred2 = pred_param.reshape(B, -1)
    gt2 = gt_param.reshape(B, -1)
    N = pred2.shape[1]
    itemsize = jnp.dtype(pred_param.dtype).itemsize

    # has_param.type(pred.type()) equivalent; compute dtype is f32. Tiny array.
    has2 = has_param.astype(jnp.float32).reshape(B, 1)

    # Tiny-input fast path: pallas_call fixed overhead dominates below this.
    if 2 * B * N * itemsize < min_pallas_bytes:
        d = pred2.astype(jnp.float32) - gt2.astype(jnp.float32)
        return jnp.sum(has2 * (d * d))

    # Dtype-aware sublane multiple (packed dtypes stack 2/4 rows per sublane).
    sublane_mult = {4: 8, 2: 16, 1: 32}.get(itemsize, 8)

    # Tile sizes: full-dim blocks when the array is small (single grid step),
    # otherwise sublane/lane-aligned tiles.  Defaults keep 2 inputs x 2 bufs
    # x tile <= ~8 MiB f32, safe on v5e (16 MiB scoped) and v7x (64 MiB/TC).
    TB = B if B <= tb else max(sublane_mult, (tb // sublane_mult) * sublane_mult)
    TN = N if N <= tn else max(128, (tn // 128) * 128)
    nb = pl.cdiv(B, TB)
    nf = pl.cdiv(N, TN)

    kernel = _make_kernel(B, N, TB, TN)

    cost = pl.CostEstimate(
        flops=3 * B * N,
        transcendentals=0,
        bytes_accessed=2 * B * N * itemsize + B * 4 + nb * nf * 8 * 128 * 4,
    )

    out = pl.pallas_call(
        kernel,
        out_shape=jax.ShapeDtypeStruct((nb, nf, 8, 128), jnp.float32),
        grid=(nb, nf),
        in_specs=[
            pl.BlockSpec((TB, 1), lambda i, j: (i, 0)),    # has (per-row flag)
            pl.BlockSpec((TB, TN), lambda i, j: (i, j)),   # pred
            pl.BlockSpec((TB, TN), lambda i, j: (i, j)),   # gt
        ],
        out_specs=pl.BlockSpec((1, 1, 8, 128), lambda i, j: (i, j, 0, 0)),
        compiler_params=pltpu.CompilerParams(
            dimension_semantics=("parallel", "parallel"),
        ),
        cost_estimate=cost,
    )(has2, pred2, gt2)

    # Sum the per-step partials (nb*nf is tiny).
    return jnp.sum(out[:, :, 0, 0])


def parameter_loss_ref(pred_param, gt_param, has_param):
    """Pure-JAX reference mirroring the PyTorch forward exactly."""
    B = pred_param.shape[0]
    num_dims = pred_param.ndim
    mask_shape = (B,) + (1,) * (num_dims - 1)
    has = has_param.astype(pred_param.dtype).reshape(mask_shape)
    loss = has * (pred_param - gt_param) ** 2
    return jnp.sum(loss)


if __name__ == "__main__":
    key = jax.random.PRNGKey(0)
    k1, k2, k3 = jax.random.split(key, 3)

    # pred/gt of shape [B, S, J, 3] (e.g. per-joint axis-angle body pose).
    B, S, J = 2, 8, 24
    pred = jax.random.normal(k1, (B, S, J, 3), dtype=jnp.float32)
    gt = jax.random.normal(k2, (B, S, J, 3), dtype=jnp.float32)
    # has_param: per-batch availability flag (float-castable, e.g. 0/1).
    has = (jax.random.uniform(k3, (B,)) > 0.3).astype(jnp.float32)

    # Force the Pallas path (the default would take the tiny-input fast path).
    out = parameter_loss(pred, gt, has, min_pallas_bytes=0)
    out = jax.block_until_ready(out)
    ref = parameter_loss_ref(pred, gt, has)
    assert jnp.allclose(out, ref, rtol=1e-5, atol=1e-5), (out, ref)

    # Exercise the tiny-input fast path as well.
    out_fast = jax.block_until_ready(parameter_loss(pred, gt, has))
    assert jnp.allclose(out_fast, ref, rtol=1e-5, atol=1e-5), (out_fast, ref)

    # Tiled + ragged-tail path (B % TB != 0, N % TN != 0), both axes tiled.
    kb1, kb2, kb3 = jax.random.split(jax.random.PRNGKey(1), 3)
    B2, N2 = 37, 700
    pred_b = jax.random.normal(kb1, (B2, N2), dtype=jnp.float32)
    gt_b = jax.random.normal(kb2, (B2, N2), dtype=jnp.float32)
    has_b = (jax.random.uniform(kb3, (B2,)) > 0.5).astype(jnp.float32)
    out_b = jax.block_until_ready(
        parameter_loss(pred_b, gt_b, has_b, tb=16, tn=512, min_pallas_bytes=0))
    ref_b = parameter_loss_ref(pred_b, gt_b, has_b)
    assert jnp.allclose(out_b, ref_b, rtol=1e-4, atol=1e-4), (out_b, ref_b)

    # bf16 path exercises the dtype-aware sublane rounding (TB multiple of 16).
    kc1, kc2, kc3 = jax.random.split(jax.random.PRNGKey(2), 3)
    B3, N3 = 40, 1200
    pred_c = jax.random.normal(kc1, (B3, N3), dtype=jnp.bfloat16)
    gt_c = jax.random.normal(kc2, (B3, N3), dtype=jnp.bfloat16)
    has_c = (jax.random.uniform(kc3, (B3,)) > 0.5).astype(jnp.float32)
    out_c = jax.block_until_ready(
        parameter_loss(pred_c, gt_c, has_c, tb=16, tn=512, min_pallas_bytes=0))
    # Kernel computes diff/square in f32 (more accurate than bf16 ref) -> loose tol.
    d_c = pred_c.astype(jnp.float32) - gt_c.astype(jnp.float32)
    ref_c = jnp.sum(has_c.reshape(B3, 1) * (d_c * d_c))
    assert jnp.allclose(out_c, ref_c, rtol=1e-2, atol=1e-2), (out_c, ref_c)

    print("KERNEL_OK")
</pallas_src>

<mosaic_0001>
module attributes {stable_mosaic.version = 11 : i64} {
  func.func @kernel(%arg0: i32, %arg1: i32, %arg2: memref<2x1xf32, #tpu.memory_space<vmem>>, %arg3: memref<2x576xf32, #tpu.memory_space<vmem>>, %arg4: memref<2x576xf32, #tpu.memory_space<vmem>>, %arg5: memref<1x1x8x128xf32, #tpu.memory_space<vmem>>) attributes {dimension_semantics = [#tpu.dimension_semantics<parallel>, #tpu.dimension_semantics<parallel>], iteration_bounds = array<i64: 1, 1>, scalar_prefetch = 0 : i64, scratch_operands = 0 : i64, tpu.core_type = #tpu.core_type<tc>, window_params = [{transform_indices = @transform_0, window_bounds = array<i64: 2, 1>}, {transform_indices = @transform_1, window_bounds = array<i64: 2, 576>}, {transform_indices = @transform_2, window_bounds = array<i64: 2, 576>}, {transform_indices = @transform_3, window_bounds = array<i64: 1, 1, 8, 128>}]} {
    %c0 = arith.constant 0 : index
    %c0_0 = arith.constant 0 : index
    %0 = vector.load %arg3[%c0, %c0_0] : memref<2x576xf32, #tpu.memory_space<vmem>>, vector<2x576xf32>
    %c0_1 = arith.constant 0 : index
    %c0_2 = arith.constant 0 : index
    %1 = vector.load %arg4[%c0_1, %c0_2] : memref<2x576xf32, #tpu.memory_space<vmem>>, vector<2x576xf32>
    %2 = arith.subf %0, %1 : vector<2x576xf32>
    %3 = arith.mulf %2, %2 : vector<2x576xf32>
    %cst = arith.constant dense<0.000000e+00> : vector<2xf32>
    %4 = vector.multi_reduction <add>, %3, %cst [1] : vector<2x576xf32> to vector<2xf32>
    %5 = vector.shape_cast %4 : vector<2xf32> to vector<2x1xf32>
    %c0_3 = arith.constant 0 : index
    %c0_4 = arith.constant 0 : index
    %6 = vector.load %arg2[%c0_3, %c0_4] : memref<2x1xf32, #tpu.memory_space<vmem>>, vector<2x1xf32>
    %7 = arith.mulf %6, %5 : vector<2x1xf32>
    %8 = vector.shape_cast %7 : vector<2x1xf32> to vector<1x2x1xf32>
    %cst_5 = arith.constant dense<0.000000e+00> : vector<1xf32>
    %9 = vector.multi_reduction <add>, %8, %cst_5 [1, 2] : vector<1x2x1xf32> to vector<1xf32>
    %10 = vector.shape_cast %9 : vector<1xf32> to vector<1x1x1xf32>
    %11 = vector.extract %10[0, 0, 0] : f32 from vector<1x1x1xf32>
    %cst_6 = arith.constant 0.000000e+00 : f32
    %12 = vector.broadcast %cst_6 : f32 to vector<1x1x8x128xf32>
    %13 = vector.broadcast %11 : f32 to vector<1x1x8x128xf32>
    %14 = arith.addf %12, %13 : vector<1x1x8x128xf32>
    %c0_7 = arith.constant 0 : index
    %c0_8 = arith.constant 0 : index
    %c0_9 = arith.constant 0 : index
    %c0_10 = arith.constant 0 : index
    %15 = vector.load %arg5[%c0_7, %c0_8, %c0_9, %c0_10] : memref<1x1x8x128xf32, #tpu.memory_space<vmem>>, vector<1x1x8x128xf32>
    tpu.vector_store %arg5[%c0_7, %c0_8, %c0_9, %c0_10], %14 {strides = array<i32>} : memref<1x1x8x128xf32, #tpu.memory_space<vmem>>, vector<1x1x8x128xf32>,
    return
  }
  func.func @transform_0(%arg0: i32, %arg1: i32) -> (i32, i32) {
    %c0_i32 = arith.constant 0 : i32
    %c0_i32_0 = arith.constant 0 : i32
    return %arg0, %c0_i32 : i32, i32
  }
  func.func @transform_1(%arg0: i32, %arg1: i32) -> (i32, i32) {
    %c0_i32 = arith.constant 0 : i32
    return %arg0, %arg1 : i32, i32
  }
  func.func @transform_2(%arg0: i32, %arg1: i32) -> (i32, i32) {
    %c0_i32 = arith.constant 0 : i32
    return %arg0, %arg1 : i32, i32
  }
  func.func @transform_3(%arg0: i32, %arg1: i32) -> (i32, i32, i32, i32) {
    %c0_i32 = arith.constant 0 : i32
    %c0_i32_0 = arith.constant 0 : i32
    %c0_i32_1 = arith.constant 0 : i32
    return %arg0, %arg1, %c0_i32, %c0_i32_0 : i32, i32, i32, i32
  }
}

</mosaic_0001>

<bundles_post_ra>
// kernel: tpu_custom_call.1
= control target key start
LH: loop header
LB: loop body
LE: loop exit
PB: predicated region body
PF: predicated region fallthrough
CT: control target
= control target key end

     0   :  { %8 = vsyncpa [#allocation3], 0  ;;  %s231_s0 = inlined_call_operand.vmem [shape: f32[2,1], index: 0, kind: input, shape index: {}]   ;;  %s232_s1 = inlined_call_operand.hbm [shape: f32[2,576], index: 1, kind: input, shape index: {}]   ;;  %s233_s2 = inlined_call_operand.hbm [shape: f32[2,576], index: 2, kind: input, shape index: {}]   ;;  %s234_s3 = inlined_call_operand.hbm [shape: f32[1,1,8,128], index: 3, kind: output, shape index: {}]  }
   0x1   :  { %9 = vsyncpa [#allocation6], 0 }
   0x2   :  { %10 = vsyncpa [#allocation4], 0  ;;  %s18_s14 = sshll.u32 %s232_s1, 4  ;;  %s196_s15 = smov [#allocation2]   ;;  %s19_s14 = int_to_ptr.hbm [resolvable:$true] %s18_s14 }
   0x3   :  { %s20_s16 = sshll.u32 %s196_s15, 4  ;;  %s29_s19 = sshll.u32 %s233_s2, 4  ;;  %s21_s16 = int_to_ptr.vmem [resolvable:$true] %s20_s16  ;;  %s30_s19 = int_to_ptr.hbm [resolvable:$true] %s29_s19 }
   0x4   :  { %23 = dma.hbm_to_vmem [thread:$0]  %s19_s14, 160, %s21_s16, [#allocation3]  }
   0x5   :  { %s197_s20 = smov [#allocation5]  }
   0x6   :  { %s31_s21 = sshll.u32 %s197_s20, 4  ;;  %s32_s21 = int_to_ptr.vmem [resolvable:$true] %s31_s21 }
   0x7   :  { %34 = dma.hbm_to_vmem [thread:$0]  %s30_s19, 160, %s32_s21, [#allocation6]  }
   0x8   :  { %190 = dma.done.wait [#allocation3], 160  }
   0x9   :  { %191 = vsyncadd [#allocation3], 4294967136 }
   0xa   :  { %192 = dma.done.wait [#allocation6], 160  }
   0xb   :  { %193 = vsyncadd [#allocation6], 4294967136  ;;  %v43_v0 = vld [vmem:[#allocation2] sm:$0xff]  ;;  %v44_v1 = vld [vmem:[#allocation2 + $0x8] sm:$0x3]  ;;  %vm66_vm0 = vcmask 1041408  }
   0xc   :  { %v45_v2 = vld [vmem:[#allocation5] sm:$0xff]  ;;  %v46_v3 = vld [vmem:[#allocation5 + $0x8] sm:$0x3]  ;;  %vm74_vm1 = vcmask 517120   ;;  %v79_v22 = vld [vmem:[%s231_s0] sm:$0x3] }
   0xd   :  { %v47_v4 = vsub.f32 %v43_v0, %v45_v2  ;;  %v48_v5 = vsub.f32 %v44_v1, %v46_v3  ;;  %vm81_vm2 = vcmask 1024   ;;  %s198_s22 = smov [#allocation7]   ;;  %s102_s26 = sshll.u32 %s234_s3, 4  ;;  %s103_s26 = int_to_ptr.hbm [resolvable:$true] %s102_s26 }
   0xe   :  { %s100_s23 = sshll.u32 %s198_s22, 4  ;;  %s101_s23 = int_to_ptr.vmem [resolvable:$true] %s100_s23 }
   0xf   :  { %v49_v6 = vmul.f32 %v47_v4, %v47_v4  ;;  %v50_v7 = vmul.f32 %v48_v5, %v48_v5 }
  0x11   :  { %53 = vst [vmem:[#allocation1] ss:$4 sm:$0xff] %v49_v6 }
  0x12   :  { %55 = vst [vmem:[#allocation1 + $0x20] ss:$4 sm:$0xff] %v50_v7 }
  0x18   :  { %v56_v8 = vld.sshfl [vmem:[#allocation1] sm:$0xff pattern:$0x73625140]  ;;  %v57_v9 = vld.sshfl [vmem:[#allocation1 + $0x8] sm:$0xff pattern:$0x73625140] }
  0x19   :  { %v58_v10 = vld.sshfl [vmem:[#allocation1 + $0x10] sm:$0xff pattern:$0x73625140]  ;;  %v59_v11 = vld.sshfl [vmem:[#allocation1 + $0x18] sm:$0xff pattern:$0x73625140] }
  0x1a   :  { %v67_v12 = vsel %vm66_vm0, %v56_v8, 0.0  ;;  %v68_v13 = vsel %vm66_vm0, %v57_v9, 0.0  ;;  %v70_v14 = vsel %vm66_vm0, %v58_v10, 0.0  ;;  %v60_v15 = vld.sshfl [vmem:[#allocation1 + $0x20] sm:$0xff pattern:$0x73625140] }
  0x1b   :  { %v69_v16 = vadd.f32 %v68_v13, %v67_v12  ;;  %v72_v17 = vsel %vm66_vm0, %v59_v11, 0.0  ;;  %v75_v19 = vsel %vm74_vm1, %v60_v15, 0.0 }
  0x1d   :  { %v71_v18 = vadd.f32 %v70_v14, %v69_v16 }
  0x1f   :  { %v73_v20 = vadd.f32 %v72_v17, %v71_v18 }
  0x21   :  { %v76_v21 = vadd.f32 %v75_v19, %v73_v20 }
  0x23   :  { %77 = vadd.xlane.f32.xlu0 %v76_v21 }
  0x96   :  { %v78_v23 = vpop.xlane.xlu0 %77 }
  0x97   :  { %v80_v24 = vmul.f32 %v79_v22, %v78_v23 }
  0x99   :  { %v82_v25 = vsel %vm81_vm2, %v80_v24, 0.0 }
  0x9a   :  { %83 = vadd.xlane.f32.xlu0 %v82_v25 }
 0x10d   :  { %v84_v26 = vpop.xlane.xlu0 %83 }
 0x10e   :  { %v85_v27 = vrot.slane %v84_v26, 4 }
 0x110   :  { %v86_v28 = vadd.f32 %v85_v27, %v84_v26 }
 0x112   :  { %v87_v29 = vrot.slane %v86_v28, 2 }
 0x114   :  { %v88_v30 = vadd.f32 %v87_v29, %v86_v28 }
 0x116   :  { %v89_v31 = vrot.slane %v88_v30, 1 }
 0x118   :  { %v90_v32 = vadd.f32 %v89_v31, %v88_v30 }
 0x11a   :  { %113 = vpush %v90_v32 }
 0x14b   :  { %s114_s0 = spop %113 }
 0x14c   :  { %v92_v33 = vstv %s114_s0 }
 0x14d   :  { %94 = vst [vmem:[#allocation7] sm:$0xff] %v92_v33 }
 0x14e   :  { %105 = dma.vmem_to_hbm [thread:$0]  %s101_s23, 128, %s103_s26, [#allocation4]  }
 0x14f   :  { %194 = dma.done.wait [#allocation4], 128  }
 0x150   :  { %195 = vsyncadd [#allocation4], 4294967168 }
 0x151   :  { %110 = vsyncpa [#allocation3], 1 }
 0x152   :  { %111 = vsyncpa [#allocation6], 1 }
 0x153   :  { %112 = vsyncpa [#allocation4], 1 }

</bundles_post_ra>
